<compile_context>
chip_gen: v6e
topology: v6e:2x2x1
jax: 0.10.0
libtpu: 0.0.40
codegen_flags: <defaults>
</compile_context>

<pallas_src>
import functools

import jax
import jax.numpy as jnp
from jax import lax
from jax.experimental import pallas as pl
from jax.experimental.pallas import tpu as pltpu

BN_EPS = 1e-5
# h-cache budget (bytes of VMEM scratch we are willing to spend on stashing h).
_H_CACHE_BUDGET = 16 * 1024 * 1024


def _round_up(x, m):
    return (x + m - 1) // m * m


def _vfunc_kernel(x_ref, w1_ref, b1_ref, gw_ref, bw2_ref, o_ref,
                  sum_ref, sumsq_ref, *maybe_h_cache,
                  n_true, tile_n, masked, cache_h):
    # x:  (tile_n, D)   w1: (D, H)   b1/gw: (1, H)   bw2: (1,) SMEM scalar
    # o:  (1, tile_n)   sum/sumsq scratch: (1, H)   optional h cache: (N_pad, H)
    phase = pl.program_id(0)
    tile = pl.program_id(1)
    h_cache_ref = maybe_h_cache[0] if cache_h else None

    @pl.when((phase == 0) & (tile == 0))
    def _init():
        sum_ref[...] = jnp.zeros_like(sum_ref)
        sumsq_ref[...] = jnp.zeros_like(sumsq_ref)

    def _layer1():
        # Layer 1 + tanh (MXU matmul, f32 accumulate; tanh on the EUP).
        return jnp.tanh(
            jnp.dot(x_ref[...], w1_ref[...], preferred_element_type=jnp.float32)
            + b1_ref[...])

    @pl.when(phase == 0)
    def _accumulate_stats():
        h = _layer1()
        if cache_h:
            row0 = pl.multiple_of(tile * tile_n, tile_n)
            h_cache_ref[pl.ds(row0, tile_n), :] = h
        if masked:
            # Zero out padded rows so they don't pollute the batch statistics.
            row = tile * tile_n + lax.broadcasted_iota(jnp.int32, (tile_n, 1), 0)
            h = jnp.where(row < n_true, h, 0.0)
        sum_ref[...] += jnp.sum(h, axis=0, keepdims=True)
        sumsq_ref[...] += jnp.sum(h * h, axis=0, keepdims=True)
        o_ref[...] = jnp.zeros_like(o_ref)  # deterministic placeholder writeback

    @pl.when(phase == 1)
    def _normalize_and_project():
        if cache_h:
            row0 = pl.multiple_of(tile * tile_n, tile_n)
            h = h_cache_ref[pl.ds(row0, tile_n), :]
        else:
            h = _layer1()  # recompute (large-N fallback; avoids N*H HBM temporary)
        inv_n = jnp.float32(1.0 / n_true)
        mean = sum_ref[...] * inv_n                         # (1, H)
        var = sumsq_ref[...] * inv_n - mean * mean          # biased var (BN train mode)
        # Fold BN scale and layer-2 weight into a single (1, H) vector, and the
        # centering + beta terms into a single (1, 1) shift.
        coeff = lax.rsqrt(var + BN_EPS) * gw_ref[...]       # inv_std * gamma * w2
        shift = bw2_ref[0] - jnp.sum(mean * coeff, keepdims=True)   # (1, 1)
        # (1,H) . (tile_n,H)^T -> (1, tile_n): result is lane-dense, so the store
        # below is a full-width (unmasked) vector store.
        pre = lax.dot_general(coeff, h, (((1,), (1,)), ((), ())),
                              preferred_element_type=jnp.float32)
        o_ref[...] = jnp.tanh(pre + shift).astype(o_ref.dtype)


def vfunc_forward(x, w1, b1, gamma, beta, w2, *, input_dtype=jnp.float32,
                  h_cache_budget=_H_CACHE_BUDGET):
    """x: (T, batch, input_dim) -> out: (T*batch, 1); matches VFunc.forward
    (BatchNorm1d uses batch statistics, i.e. training-mode forward math).

    `input_dtype=jnp.bfloat16` may be used to halve the HBM traffic of the x
    stream (MXU operands only; stats/tanh stay f32) -- relax the verification
    tolerance accordingly if enabled.
    """
    T, batch = x.shape[0], x.shape[1]
    n = T * batch
    d = w1.shape[0]
    hdim = w1.shape[1]

    x2d = x.reshape(n, d).astype(input_dtype)
    w1c = w1.astype(input_dtype)
    b1_row = b1.reshape(1, hdim).astype(jnp.float32)
    w2_col = w2.reshape(hdim).astype(jnp.float32)
    # Fold BN affine + layer 2 outside the kernel: gamma*w2 row and beta.w2 scalar.
    gw_row = gamma.reshape(1, hdim).astype(jnp.float32) * w2_col[None, :]
    bw2 = jnp.dot(beta.reshape(hdim).astype(jnp.float32), w2_col).reshape(1)

    # Row tiling: a single tile for small N, otherwise 512-row tiles (multiple of
    # 128 -> lane-dense output blocks).
    if n <= 1024:
        tile_n = max(8, _round_up(n, 8))
    else:
        tile_n = 512
    n_pad = _round_up(n, tile_n)
    num_tiles = n_pad // tile_n
    if n_pad != n:
        x2d = jnp.pad(x2d, ((0, n_pad - n), (0, 0)))

    # Decide whether h (N_pad, H) fits in a VMEM scratch (use the physically
    # padded lane width for the estimate).
    hdim_phys = _round_up(hdim, 128)
    cache_h = (n_pad * hdim_phys * 4) <= h_cache_budget

    kernel = functools.partial(_vfunc_kernel, n_true=n, tile_n=tile_n,
                               masked=(n_pad != n), cache_h=cache_h)

    if cache_h:
        # Phase 1 never reads x: keep the x block index pinned to 0 so the
        # pipeline does not re-stream x tiles that will never be used.
        x_index_map = lambda p, i: (i * (1 - p), 0)
    else:
        x_index_map = lambda p, i: (i, 0)

    scratch_shapes = [
        pltpu.VMEM((1, hdim), jnp.float32),   # sum(h) over rows
        pltpu.VMEM((1, hdim), jnp.float32),   # sum(h^2) over rows
    ]
    if cache_h:
        scratch_shapes.append(pltpu.VMEM((n_pad, hdim), jnp.float32))  # h cache

    out_row = pl.pallas_call(
        kernel,
        out_shape=jax.ShapeDtypeStruct((1, n_pad), jnp.float32),
        grid=(2, num_tiles),  # (phase, row tile); phase 0 = stats, phase 1 = output
        in_specs=[
            pl.BlockSpec((tile_n, d), x_index_map),             # x: streamed/pipelined
            pl.BlockSpec((d, hdim), lambda p, i: (0, 0)),       # w1: resident
            pl.BlockSpec((1, hdim), lambda p, i: (0, 0)),       # b1
            pl.BlockSpec((1, hdim), lambda p, i: (0, 0)),       # gamma * w2
            pl.BlockSpec(memory_space=pltpu.MemorySpace.SMEM),  # beta . w2 (scalar)
        ],
        out_specs=pl.BlockSpec((1, tile_n), lambda p, i: (0, i)),
        scratch_shapes=scratch_shapes,
        compiler_params=pltpu.CompilerParams(
            # Both axes are sequential: stats accumulate across row tiles and the
            # output pass depends on the completed stats.
            # TODO(synk): on v7x, split row tiles across the 2 TensorCores
            # ("parallel" / core_map) with per-core partial stats and a
            # cross-core combine (CMEM + core_barrier) before phase 1.
            dimension_semantics=("arbitrary", "arbitrary"),
            vmem_limit_bytes=32 * 1024 * 1024,
        ),
    )(x2d, w1c, b1_row, gw_row, bw2)

    return out_row[0, :n].reshape(n, 1)


def init_params(key, input_dim, hidden_dim):
    """Deterministic PyTorch-style (uniform +-1/sqrt(fan_in)) init."""
    k1, k2, k3 = jax.random.split(key, 3)
    bound1 = 1.0 / jnp.sqrt(float(input_dim))
    w1 = jax.random.uniform(k1, (input_dim, hidden_dim), jnp.float32,
                            minval=-bound1, maxval=bound1)
    b1 = jax.random.uniform(k2, (hidden_dim,), jnp.float32,
                            minval=-bound1, maxval=bound1)
    gamma = jnp.ones((hidden_dim,), jnp.float32)   # BatchNorm1d weight
    beta = jnp.zeros((hidden_dim,), jnp.float32)   # BatchNorm1d bias
    bound2 = 1.0 / jnp.sqrt(float(hidden_dim))
    w2 = jax.random.uniform(k3, (hidden_dim, 1), jnp.float32,
                            minval=-bound2, maxval=bound2)
    return w1, b1, gamma, beta, w2


def reference_forward(x, w1, b1, gamma, beta, w2):
    """Pure-JAX reference of the PyTorch forward (BN in training mode)."""
    T, batch = x.shape[0], x.shape[1]
    x2d = x.reshape(T * batch, -1)
    h = jnp.tanh(x2d @ w1 + b1[None, :])
    mean = jnp.mean(h, axis=0, keepdims=True)
    var = jnp.mean((h - mean) ** 2, axis=0, keepdims=True)
    hn = (h - mean) / jnp.sqrt(var + BN_EPS) * gamma[None, :] + beta[None, :]
    return jnp.tanh(hn @ w2)


if __name__ == "__main__":
    key = jax.random.PRNGKey(0)
    kx1, kx2, kp = jax.random.split(key, 3)

    input_dim, hidden_dim = 32, 100   # hidden_dim=100 is the module default
    w1, b1, gamma, beta, w2 = init_params(kp, input_dim, hidden_dim)

    # TODO(synk): BatchNorm1d running_mean/running_var are not updated; this
    # reproduces the training-mode forward value only, not the module's state.

    # Case 1: small (single row-tile, cached-h path).
    T1, batch1 = 8, 4
    x1 = jax.random.normal(kx1, (T1, batch1, input_dim), jnp.float32)
    out1 = jax.block_until_ready(vfunc_forward(x1, w1, b1, gamma, beta, w2))
    ref1 = reference_forward(x1, w1, b1, gamma, beta, w2)
    assert out1.shape == (T1 * batch1, 1), out1.shape
    assert jnp.allclose(out1, ref1, atol=1e-4, rtol=1e-4), "mismatch vs reference (small)"

    # Case 2: larger -- multi-tile streaming + row padding/masking, cached-h path.
    T2, batch2 = 160, 9   # N = 1440 -> three 512-row tiles, 96 padded rows masked
    x2 = jax.random.normal(kx2, (T2, batch2, input_dim), jnp.float32)
    out2 = jax.block_until_ready(vfunc_forward(x2, w1, b1, gamma, beta, w2))
    ref2 = reference_forward(x2, w1, b1, gamma, beta, w2)
    assert out2.shape == (T2 * batch2, 1), out2.shape
    assert jnp.allclose(out2, ref2, atol=1e-4, rtol=1e-4), "mismatch vs reference (tiled)"

    # Case 3: same data, but force the large-N fallback (re-stream + recompute h).
    out3 = jax.block_until_ready(
        vfunc_forward(x2, w1, b1, gamma, beta, w2, h_cache_budget=0))
    assert jnp.allclose(out3, ref2, atol=1e-4, rtol=1e-4), "mismatch vs reference (fallback)"

    print("KERNEL_OK")
</pallas_src>

<mosaic_0001>
module attributes {stable_mosaic.version = 11 : i64} {
  func.func @_vfunc_kernel(%arg0: i32, %arg1: i32, %arg2: memref<32x32xf32, #tpu.memory_space<vmem>>, %arg3: memref<32x100xf32, #tpu.memory_space<vmem>>, %arg4: memref<1x100xf32, #tpu.memory_space<vmem>>, %arg5: memref<1x100xf32, #tpu.memory_space<vmem>>, %arg6: memref<1xf32, #tpu.memory_space<smem>>, %arg7: memref<1x32xf32, #tpu.memory_space<vmem>>, %arg8: memref<1x100xf32, #tpu.memory_space<vmem>>, %arg9: memref<1x100xf32, #tpu.memory_space<vmem>>, %arg10: memref<32x100xf32, #tpu.memory_space<vmem>>) attributes {dimension_semantics = [#tpu.dimension_semantics<arbitrary>, #tpu.dimension_semantics<arbitrary>], iteration_bounds = array<i64: 2, 1>, scalar_prefetch = 0 : i64, scratch_operands = 3 : i64, tpu.core_type = #tpu.core_type<tc>, window_params = [{transform_indices = @transform_0, window_bounds = array<i64: 32, 32>}, {pipeline_mode = #tpu.pipeline_mode<synchronous>, transform_indices = @transform_1, window_bounds = array<i64: 32, 100>}, {pipeline_mode = #tpu.pipeline_mode<synchronous>, transform_indices = @transform_2, window_bounds = array<i64: 1, 100>}, {pipeline_mode = #tpu.pipeline_mode<synchronous>, transform_indices = @transform_3, window_bounds = array<i64: 1, 100>}, {transform_indices = @transform_4, window_bounds = array<i64: 1>}, {transform_indices = @transform_5, window_bounds = array<i64: 1, 32>}]} {
    %c0_i32 = arith.constant 0 : i32
    %0 = arith.cmpi eq, %arg0, %c0_i32 : i32
    %c0_i32_0 = arith.constant 0 : i32
    %1 = arith.cmpi eq, %arg1, %c0_i32_0 : i32
    %2 = arith.andi %0, %1 : i1
    %3 = arith.extui %2 : i1 to i32
    %c0_i32_1 = arith.constant 0 : i32
    %4 = arith.cmpi ne, %3, %c0_i32_1 : i32
    scf.if %4 {
      %cst = arith.constant 0.000000e+00 : f32
      %11 = vector.broadcast %cst : f32 to vector<1x100xf32>
      %c0 = arith.constant 0 : index
      %c0_5 = arith.constant 0 : index
      %12 = vector.load %arg8[%c0, %c0_5] : memref<1x100xf32, #tpu.memory_space<vmem>>, vector<1x100xf32>
      tpu.vector_store %arg8[%c0, %c0_5], %11 {strides = array<i32>} : memref<1x100xf32, #tpu.memory_space<vmem>>, vector<1x100xf32>,
      %cst_6 = arith.constant 0.000000e+00 : f32
      %13 = vector.broadcast %cst_6 : f32 to vector<1x100xf32>
      %c0_7 = arith.constant 0 : index
      %c0_8 = arith.constant 0 : index
      %14 = vector.load %arg9[%c0_7, %c0_8] : memref<1x100xf32, #tpu.memory_space<vmem>>, vector<1x100xf32>
      tpu.vector_store %arg9[%c0_7, %c0_8], %13 {strides = array<i32>} : memref<1x100xf32, #tpu.memory_space<vmem>>, vector<1x100xf32>,
    } else {
    }
    %c0_i32_2 = arith.constant 0 : i32
    %5 = arith.cmpi eq, %arg0, %c0_i32_2 : i32
    %6 = arith.extui %5 : i1 to i32
    %c0_i32_3 = arith.constant 0 : i32
    %7 = arith.cmpi ne, %6, %c0_i32_3 : i32
    scf.if %7 {
      %c0 = arith.constant 0 : index
      %c0_5 = arith.constant 0 : index
      %11 = vector.load %arg2[%c0, %c0_5] : memref<32x32xf32, #tpu.memory_space<vmem>>, vector<32x32xf32>
      %c0_6 = arith.constant 0 : index
      %c0_7 = arith.constant 0 : index
      %12 = vector.load %arg3[%c0_6, %c0_7] : memref<32x100xf32, #tpu.memory_space<vmem>>, vector<32x100xf32>
      %cst = arith.constant dense<0.000000e+00> : vector<32x100xf32>
      %13 = tpu.matmul %11, %12, %cst {dimension_numbers = #tpu.dot_dimension_numbers<[1], [0], [0], [1], [0, 0, 1, 1], [], []>} : vector<32x32xf32>, vector<32x100xf32>, vector<32x100xf32> -> vector<32x100xf32>
      %c0_8 = arith.constant 0 : index
      %c0_9 = arith.constant 0 : index
      %14 = vector.load %arg4[%c0_8, %c0_9] : memref<1x100xf32, #tpu.memory_space<vmem>>, vector<1x100xf32>
      %15 = vector.broadcast %14 : vector<1x100xf32> to vector<32x100xf32>
      %16 = arith.addf %13, %15 : vector<32x100xf32>
      %17 = math.tanh %16 : vector<32x100xf32>
      %c32_i32 = arith.constant 32 : i32
      %18 = arith.muli %arg1, %c32_i32 : i32
      %19 = tpu.assume_multiple %18, 32 : i32
      %20 = arith.index_cast %19 : i32 to index
      %c0_10 = arith.constant 0 : index
      %21 = vector.load %arg10[%20, %c0_10] : memref<32x100xf32, #tpu.memory_space<vmem>>, vector<32x100xf32>
      tpu.vector_store %arg10[%20, %c0_10], %17 {strides = array<i32>} : memref<32x100xf32, #tpu.memory_space<vmem>>, vector<32x100xf32>,
      %c0_11 = arith.constant 0 : index
      %c0_12 = arith.constant 0 : index
      %22 = vector.load %arg8[%c0_11, %c0_12] : memref<1x100xf32, #tpu.memory_space<vmem>>, vector<1x100xf32>
      %cst_13 = arith.constant dense<0.000000e+00> : vector<100xf32>
      %23 = vector.multi_reduction <add>, %17, %cst_13 [0] : vector<32x100xf32> to vector<100xf32>
      %24 = vector.shape_cast %23 : vector<100xf32> to vector<1x100xf32>
      %25 = arith.addf %22, %24 : vector<1x100xf32>
      %c0_14 = arith.constant 0 : index
      %c0_15 = arith.constant 0 : index
      %26 = vector.load %arg8[%c0_14, %c0_15] : memref<1x100xf32, #tpu.memory_space<vmem>>, vector<1x100xf32>
      tpu.vector_store %arg8[%c0_14, %c0_15], %25 {strides = array<i32>} : memref<1x100xf32, #tpu.memory_space<vmem>>, vector<1x100xf32>,
      %c0_16 = arith.constant 0 : index
      %c0_17 = arith.constant 0 : index
      %27 = vector.load %arg9[%c0_16, %c0_17] : memref<1x100xf32, #tpu.memory_space<vmem>>, vector<1x100xf32>
      %28 = arith.mulf %17, %17 : vector<32x100xf32>
      %cst_18 = arith.constant dense<0.000000e+00> : vector<100xf32>
      %29 = vector.multi_reduction <add>, %28, %cst_18 [0] : vector<32x100xf32> to vector<100xf32>
      %30 = vector.shape_cast %29 : vector<100xf32> to vector<1x100xf32>
      %31 = arith.addf %27, %30 : vector<1x100xf32>
      %c0_19 = arith.constant 0 : index
      %c0_20 = arith.constant 0 : index
      %32 = vector.load %arg9[%c0_19, %c0_20] : memref<1x100xf32, #tpu.memory_space<vmem>>, vector<1x100xf32>
      tpu.vector_store %arg9[%c0_19, %c0_20], %31 {strides = array<i32>} : memref<1x100xf32, #tpu.memory_space<vmem>>, vector<1x100xf32>,
      %cst_21 = arith.constant 0.000000e+00 : f32
      %33 = vector.broadcast %cst_21 : f32 to vector<1x32xf32>
      %c0_22 = arith.constant 0 : index
      %c0_23 = arith.constant 0 : index
      %34 = vector.load %arg7[%c0_22, %c0_23] : memref<1x32xf32, #tpu.memory_space<vmem>>, vector<1x32xf32>
      tpu.vector_store %arg7[%c0_22, %c0_23], %33 {strides = array<i32>} : memref<1x32xf32, #tpu.memory_space<vmem>>, vector<1x32xf32>,
    } else {
    }
    %c1_i32 = arith.constant 1 : i32
    %8 = arith.cmpi eq, %arg0, %c1_i32 : i32
    %9 = arith.extui %8 : i1 to i32
    %c0_i32_4 = arith.constant 0 : i32
    %10 = arith.cmpi ne, %9, %c0_i32_4 : i32
    scf.if %10 {
      %c32_i32 = arith.constant 32 : i32
      %11 = arith.muli %arg1, %c32_i32 : i32
      %12 = tpu.assume_multiple %11, 32 : i32
      %13 = arith.index_cast %12 : i32 to index
      %c0 = arith.constant 0 : index
      %14 = vector.load %arg10[%13, %c0] : memref<32x100xf32, #tpu.memory_space<vmem>>, vector<32x100xf32>
      %c0_5 = arith.constant 0 : index
      %c0_6 = arith.constant 0 : index
      %15 = vector.load %arg8[%c0_5, %c0_6] : memref<1x100xf32, #tpu.memory_space<vmem>>, vector<1x100xf32>
      %cst = arith.constant 3.125000e-02 : f32
      %16 = vector.broadcast %cst : f32 to vector<1x100xf32>
      %17 = arith.mulf %15, %16 : vector<1x100xf32>
      %c0_7 = arith.constant 0 : index
      %c0_8 = arith.constant 0 : index
      %18 = vector.load %arg9[%c0_7, %c0_8] : memref<1x100xf32, #tpu.memory_space<vmem>>, vector<1x100xf32>
      %cst_9 = arith.constant 3.125000e-02 : f32
      %19 = vector.broadcast %cst_9 : f32 to vector<1x100xf32>
      %20 = arith.mulf %18, %19 : vector<1x100xf32>
      %21 = arith.mulf %17, %17 : vector<1x100xf32>
      %22 = arith.subf %20, %21 : vector<1x100xf32>
      %cst_10 = arith.constant 9.99999974E-6 : f32
      %23 = vector.broadcast %cst_10 : f32 to vector<1x100xf32>
      %24 = arith.addf %22, %23 : vector<1x100xf32>
      %25 = math.rsqrt %24 : vector<1x100xf32>
      %c0_11 = arith.constant 0 : index
      %c0_12 = arith.constant 0 : index
      %26 = vector.load %arg5[%c0_11, %c0_12] : memref<1x100xf32, #tpu.memory_space<vmem>>, vector<1x100xf32>
      %27 = arith.mulf %25, %26 : vector<1x100xf32>
      %c0_13 = arith.constant 0 : index
      %28 = memref.load %arg6[%c0_13] : memref<1xf32, #tpu.memory_space<smem>>
      %29 = arith.mulf %17, %27 : vector<1x100xf32>
      %30 = vector.shape_cast %29 : vector<1x100xf32> to vector<1x1x100xf32>
      %cst_14 = arith.constant dense<0.000000e+00> : vector<1xf32>
      %31 = vector.multi_reduction <add>, %30, %cst_14 [1, 2] : vector<1x1x100xf32> to vector<1xf32>
      %32 = vector.shape_cast %31 : vector<1xf32> to vector<1x1x1xf32>
      %33 = vector.extract %32[0, 0, 0] : f32 from vector<1x1x1xf32>
      %34 = vector.broadcast %33 : f32 to vector<1x1xf32>
      %35 = vector.broadcast %28 : f32 to vector<1x1xf32>
      %36 = arith.subf %35, %34 : vector<1x1xf32>
      %cst_15 = arith.constant dense<0.000000e+00> : vector<1x32xf32>
      %37 = tpu.matmul %27, %14, %cst_15 {dimension_numbers = #tpu.dot_dimension_numbers<[1], [1], [0], [0], [0, 0, 1, 0], [], []>} : vector<1x100xf32>, vector<32x100xf32>, vector<1x32xf32> -> vector<1x32xf32>
      %38 = vector.broadcast %36 : vector<1x1xf32> to vector<1x32xf32>
      %39 = arith.addf %37, %38 : vector<1x32xf32>
      %40 = math.tanh %39 : vector<1x32xf32>
      %c0_16 = arith.constant 0 : index
      %c0_17 = arith.constant 0 : index
      %41 = vector.load %arg7[%c0_16, %c0_17] : memref<1x32xf32, #tpu.memory_space<vmem>>, vector<1x32xf32>
      tpu.vector_store %arg7[%c0_16, %c0_17], %40 {strides = array<i32>} : memref<1x32xf32, #tpu.memory_space<vmem>>, vector<1x32xf32>,
    } else {
    }
    return
  }
  func.func @transform_0(%arg0: i32, %arg1: i32) -> (i32, i32) {
    %c1_i32 = arith.constant 1 : i32
    %0 = arith.subi %c1_i32, %arg0 : i32
    %1 = arith.muli %arg1, %0 : i32
    %c0_i32 = arith.constant 0 : i32
    %c0_i32_0 = arith.constant 0 : i32
    return %1, %c0_i32 : i32, i32
  }
  func.func @transform_1(%arg0: i32, %arg1: i32) -> (i32, i32) {
    %c0_i32 = arith.constant 0 : i32
    %c0_i32_0 = arith.constant 0 : i32
    %c0_i32_1 = arith.constant 0 : i32
    return %c0_i32, %c0_i32_0 : i32, i32
  }
  func.func @transform_2(%arg0: i32, %arg1: i32) -> (i32, i32) {
    %c0_i32 = arith.constant 0 : i32
    %c0_i32_0 = arith.constant 0 : i32
    %c0_i32_1 = arith.constant 0 : i32
    return %c0_i32, %c0_i32_0 : i32, i32
  }
  func.func @transform_3(%arg0: i32, %arg1: i32) -> (i32, i32) {
    %c0_i32 = arith.constant 0 : i32
    %c0_i32_0 = arith.constant 0 : i32
    %c0_i32_1 = arith.constant 0 : i32
    return %c0_i32, %c0_i32_0 : i32, i32
  }
  func.func @transform_4(%arg0: i32, %arg1: i32) -> i32 {
    %c0_i32 = arith.constant 0 : i32
    %c0_i32_0 = arith.constant 0 : i32
    return %c0_i32 : i32
  }
  func.func @transform_5(%arg0: i32, %arg1: i32) -> (i32, i32) {
    %c0_i32 = arith.constant 0 : i32
    %c0_i32_0 = arith.constant 0 : i32
    return %c0_i32, %arg1 : i32, i32
  }
}

</mosaic_0001>

<bundles_post_ra>
// kernel: tpu_custom_call.1
= control target key start
LH: loop header
LB: loop body
LE: loop exit
PB: predicated region body
PF: predicated region fallthrough
CT: control target
= control target key end

     0   :  { %s1082_s0 = inlined_call_operand.hbm [shape: f32[32,32], index: 0, kind: input, shape index: {}]   ;;  %s1083_s1 = inlined_call_operand.hbm [shape: f32[32,100], index: 1, kind: input, shape index: {}]   ;;  %s1084_s2 = inlined_call_operand.vmem [shape: f32[1,100], index: 2, kind: input, shape index: {}]   ;;  %s1085_s3 = inlined_call_operand.vmem [shape: f32[1,100], index: 3, kind: input, shape index: {}]   ;;  %s1086_s4 = inlined_call_operand.<no memory space> [shape: f32[1], index: 4, kind: input, shape index: {}]   ;;  %s1087_s5 = inlined_call_operand.hbm [shape: f32[1,32], index: 5, kind: output, shape index: {}]  }
   0x1   :  { %10 = sst [smem:[#allocation5]] %s1086_s4 }
   0x2   :  { %11 = vsyncpa [#allocation7], 0 }
   0x3   :  { %13 = vsyncpa [#allocation7 + $0x1], 0 }
   0x4   :  { %14 = vsyncpa [#allocation10], 0 }
   0x5   :  { %15 = vsyncpa [#allocation8], 0  ;;  %s957_s20 = smov 0   ;;  %s959_s21 = smov 0  }
   0x6   :  { %s961_s22 = smov 0  }
   0x7 LB: > { %s657_s4 = sadd.s32 4294967295, %s913_s22   ;;  %s33_s23 = sadd.s32 1, %s909_s21  ;;  %s913_s22 = sphi %s961_s22, %s21_s22   ;;  %s909_s21 = sphi %s959_s21, %s1094_s21   ;;  %s905_s20 = sphi %s957_s20, %s1093_s20  }
   0x8   : > { %p35_p0 = scmp.ge.s32.totalorder %s33_s23, 2  ;;  %p658_p1 = scmp.ge.s32.totalorder %s913_s22, 1 }
   0x9   : > { %p178_p2 = scmp.lt.s32.totalorder %s913_s22, 3  ;;  %p984_p4 = scmp.eq.s32.totalorder %s657_s4, 0 }
   0xa   : > { %s1096_s23 = smov (%p35_p0, %s33_s23), 0  ;;  %s915_s26 = smov [#allocation9]  }
   0xb   : > { %p978_p3 = pnand %p658_p1, %p178_p2  ;;  %s190_s27 = sshll.u32 %s915_s26, 4  ;;  %s191_s27 = int_to_ptr.vmem [resolvable:$true] %s190_s27 }
   0xc   : > { %p752_p7 = scmp.lt.s32.totalorder %s913_s22, 2  ;;  %p753_p8 = scmp.eq.s32.totalorder %s913_s22, 0 }
   0xd   : > { %p743_p5 = pneg %p978_p3  ;;  %s814_s29 = scalar_lea.vmem %s191_s27, 512 }
   0xe   : > { %p815_p10 = scmp.ne.s32.totalorder %s191_s27, %s814_s29  ;;  %p822_p13 = scmp.lt.s32.totalorder %s191_s27, %s191_s27 }
   0xf   : > { %p992_p6 = pnand %p984_p4, %p743_p5  ;;  %p823_p0 = scmp.lt.s32.totalorder %s814_s29, %s814_s29 }
  0x11   : > { %p805_p9 = pneg %p992_p6  ;;  %p824_p1 = por %p823_p0, %p822_p13 }
  0x13   : > { %p817_p11 = pnand %p815_p10, %p805_p9 }
  0x15   : > { %p818_p12 = pneg %p817_p11 }
  0x17   : > { %p825_p2 = pnand %p824_p1, %p818_p12 }
  0x19   : > { %828 = shalt.err (!%p825_p2)
}
  0x1a   : > { %s916_s30 = smov 128   ;;  %s917_s6 = smov 8  }
  0x1b   : > { %746 = dma.hbm_to_vmem [thread:$0]  (!%p992_p6), %s1083_s1, 512, %s191_s27, [#allocation10], %s916_s30, %s916_s30, %s917_s6  }
  0x1c   : > { %p1009_p5 = pnand %p753_p8, %p752_p7  ;;  %s918_s10 = smov [#allocation6]  }
  0x1d   : > { %s226_s11 = sshll.u32 %s918_s10, 4  ;;  %s227_s11 = int_to_ptr.vmem [resolvable:$true] %s226_s11 }
  0x1e   : > { %p831_p9 = pneg %p1009_p5  ;;  %s840_s12 = scalar_lea.vmem %s227_s11, 512 }
  0x1f   : > { %p841_p10 = scmp.ne.s32.totalorder %s227_s11, %s840_s12  ;;  %s847_s13 = scalar_lea.vmem %s227_s11, 1024 }
  0x20   : > { %p848_p13 = scmp.lt.s32.totalorder %s227_s11, %s227_s11  ;;  %p849_p0 = scmp.lt.s32.totalorder %s847_s13, %s840_s12 }
  0x21   : > { %p843_p11 = pnand %p841_p10, %p831_p9 }
  0x22   : > { %p850_p6 = por %p849_p0, %p848_p13 }
  0x23   : > { %p844_p12 = pneg %p843_p11 }
  0x25   : > { %p851_p1 = pnand %p850_p6, %p844_p12 }
  0x27   : > { %854 = shalt.err (!%p851_p1)
}
  0x28   : > { %750 = dma.hbm_to_vmem [thread:$0]  (!%p1009_p5), %s1082_s0, 512, %s227_s11, [#allocation7], %s916_s30, %s916_s30, %s917_s6  }
  0x29   : > { %238 = sbr.rel (%p978_p3) target bundleno = 579 (0x243), region = 40 }
  0x2e   : > { %892 = dma.done.wait (%p984_p4), [#allocation7], 512  }
  0x2f   : > { %894 = vsyncadd (%p984_p4), [#allocation7], 4294966784 }
  0x30   : > { %896 = dma.done.wait (%p984_p4), [#allocation10], 512  }
  0x31   : > { %898 = vsyncadd (%p984_p4), [#allocation10], 4294966784  ;;  %p273_p7 = scmp.eq.s32.totalorder %s905_s20, 0 }
  0x32   : > { %vm279_vm0 = vcmask (%p273_p7), 811008   ;;  %v919_v0 = vmov (%p273_p7), 0.0  }
  0x33   : > { %278 = sbr.rel (!%p273_p7) target bundleno = 56 (0x38), region = 52  ;;  %280 = vst.msk [vmem:[#allocation2] sm:$0x1] (%p273_p7), %vm279_vm0, %v919_v0  ;;  %281 = vst.msk [vmem:[#allocation3] sm:$0x1] (%p273_p7), %vm279_vm0, %v919_v0 }
  0x38 PF: > { %p666_p3 = scmp.ne.s32.totalorder %s905_s20, 0 }
  0x3a   : > { %284 = sbr.rel (%p666_p3) target bundleno = 308 (0x134), region = 56 }
  0x3f   : > { %v292_v1 = vld [vmem:[#allocation9 + $0x18] sm:$0xff]  ;;  %v291_v2 = vld [vmem:[#allocation9 + $0x10] sm:$0xff]  ;;  %v290_v3 = vld [vmem:[#allocation9 + $0x8] sm:$0xff]  ;;  %vm300_vm1 = vcmask 261120   ;;  %vm446_vm2 = vcmask 253952   ;;  %v920_v9 = vmov 0.0  }
  0x40   : > { %696 = vmatprep.subr.mxu0 %v292_v1  ;;  %721 = vmatprep.subr.mxu1 %v292_v1  ;;  %v289_v4 = vld [vmem:[#allocation9] sm:$0xff]  ;;  %v287_v6 = vld [vmem:[#allocation6 + $0x10] sm:$0xff]  ;;  %v286_v7 = vld [vmem:[#allocation6 + $0x8] sm:$0xff]  ;;  %447 = vst.msk [vmem:[#allocation11] sm:$0x1] %vm446_vm2, %v920_v9  ;;  %vm404_vm3 = vcmask 818176  }
  0x41   : > { %697 = vmatpush3.msra.mxu0 %v292_v1  ;;  %725 = vmatpush3.msra.mxu1 %v292_v1  ;;  %v285_v5 = vld [vmem:[#allocation6] sm:$0xff]  ;;  %v288_v8 = vld [vmem:[#allocation6 + $0x18] sm:$0xff]  ;;  %vm424_vm4 = vcmask 811008  }
  0x42   : > { %698 = vmatprep.subr.mxu0 %v291_v2  ;;  %722 = vmatprep.subr.mxu1 %v291_v2  ;;  %v667_v10 = vld [vmem:[%s1084_s2] ss:$0 sm:$0xff]  ;;  %v426_v53 = vld [vmem:[#allocation3] sm:$0x1] }
  0x43   : > { %699 = vmatpush3.msra.mxu0 %v291_v2  ;;  %726 = vmatpush3.msra.mxu1 %v291_v2  ;;  %v409_v50 = vld [vmem:[#allocation2] sm:$0x1] }
  0x44   : > { %700 = vmatprep.subr.mxu0 %v290_v3  ;;  %723 = vmatprep.subr.mxu1 %v290_v3 }
  0x45   : > { %701 = vmatpush3.msra.mxu0 %v290_v3  ;;  %727 = vmatpush3.msra.mxu1 %v290_v3 }
  0x46   : > { %702 = vmatprep.subr.mxu0 %v289_v4  ;;  %724 = vmatprep.subr.mxu1 %v289_v4 }
  0x47   : > { %703 = vmatpush3.msra.mxu0 %v289_v4  ;;  %728 = vmatpush3.msra.mxu1 %v289_v4 }
  0x48   : > { %704 = vmatprep.mubr.msk.f32.mxu0 %vm300_vm1, %v285_v5  ;;  %707 = vmatprep.mubr.msk.f32.mxu1 %vm300_vm1, %v287_v6 }
  0x49   : > { %705 = vmatmul.mubr.msk.f32.vlgmr.msra.gmra.mxu0 %vm300_vm1, %v286_v7  ;;  %708 = vmatmul.mubr.msk.f32.vlgmr.msra.gmra.mxu1 %vm300_vm1, %v288_v8 }
 0x109   : > { %v706_v11 = vpop.f32.mrf.mxu0  ;;  %v709_v12 = vpop.f32.mrf.mxu1 }
 0x10a   : > { %v385_v13 = vadd.f32 %v706_v11, %v667_v10  ;;  %v395_v14 = vadd.f32 %v709_v12, %v667_v10 }
 0x10b   : > { %v379_v15 = vpop.f32.mrf.mxu0  ;;  %v389_v16 = vpop.f32.mrf.mxu1 }
 0x10c   : > { %791 = vtanh.f32 %v385_v13  ;;  %v380_v17 = vadd.f32 %v667_v10, %v379_v15  ;;  %v390_v18 = vadd.f32 %v667_v10, %v389_v16 }
 0x10d   : > { %793 = vtanh.f32 %v395_v14 }
 0x10e   : > { %795 = vtanh.f32 %v380_v17 }
 0x10f   : > { %797 = vtanh.f32 %v390_v18 }
 0x119   : > { %v792_v19 = vpop.eup %791 }
 0x11a   : > { %v794_v20 = vpop.eup %793  ;;  %406 = vst.msk [vmem:[#allocation4 + $0x8] sm:$0xff] %vm404_vm3, %v792_v19  ;;  %v428_v21 = vmul.f32 %v792_v19, %v792_v19  ;;  %v411_v24 = vsel %vm404_vm3, %v792_v19, 0.0 }
 0x11b   : > { %v796_v22 = vpop.eup %795  ;;  %408 = vst.msk [vmem:[#allocation4 + $0x18] sm:$0xff] %vm404_vm3, %v794_v20  ;;  %v430_v30 = vmul.f32 %v794_v20, %v794_v20  ;;  %v415_v35 = vsel %vm404_vm3, %v794_v20, 0.0 }
 0x11c   : > { %v798_v23 = vpop.eup %797  ;;  %405 = vst.msk [vmem:[#allocation4] sm:$0xff] %vm404_vm3, %v796_v22  ;;  %v410_v25 = vsel %vm404_vm3, %v796_v22, 0.0  ;;  %v427_v26 = vmul.f32 %v796_v22, %v796_v22  ;;  %v432_v29 = vsel %vm404_vm3, %v428_v21, 0.0 }
 0x11d   : > { %v412_v27 = vadd.f32 %v411_v24, %v410_v25  ;;  %407 = vst.msk [vmem:[#allocation4 + $0x10] sm:$0xff] %vm404_vm3, %v798_v23  ;;  %v429_v28 = vmul.f32 %v798_v23, %v798_v23  ;;  %v413_v32 = vsel %vm404_vm3, %v798_v23, 0.0  ;;  %v436_v39 = vsel %vm404_vm3, %v430_v30, 0.0 }
 0x11e   : > { %v431_v31 = vsel %vm404_vm3, %v427_v26, 0.0 }
 0x11f   : > { %v433_v33 = vadd.f32 %v432_v29, %v431_v31  ;;  %v414_v34 = vadd.f32 %v413_v32, %v412_v27  ;;  %v434_v36 = vsel %vm404_vm3, %v429_v28, 0.0 }
 0x121   : > { %v416_v37 = vadd.f32 %v415_v35, %v414_v34  ;;  %v435_v38 = vadd.f32 %v434_v36, %v433_v33 }
 0x123   : > { %v417_v40 = vrot.slane %v416_v37, 4  ;;  %v437_v41 = vadd.f32 %v436_v39, %v435_v38 }
 0x125   : > { %v418_v42 = vadd.f32 %v417_v40, %v416_v37  ;;  %v438_v43 = vrot.slane %v437_v41, 4 }
 0x127   : > { %v419_v44 = vrot.slane %v418_v42, 2  ;;  %v439_v45 = vadd.f32 %v438_v43, %v437_v41 }
 0x129   : > { %v420_v46 = vadd.f32 %v419_v44, %v418_v42  ;;  %v440_v47 = vrot.slane %v439_v45, 2 }
 0x12b   : > { %v421_v48 = vrot.slane %v420_v46, 1  ;;  %v441_v49 = vadd.f32 %v440_v47, %v439_v45 }
 0x12d   : > { %v422_v51 = vadd.f32 %v421_v48, %v420_v46  ;;  %v442_v52 = vrot.slane %v441_v49, 1 }
 0x12f   : > { %v423_v54 = vadd.f32 %v422_v51, %v409_v50  ;;  %v443_v55 = vadd.f32 %v442_v52, %v441_v49 }
 0x131   : > { %425 = vst.msk [vmem:[#allocation2] sm:$0x1] %vm424_vm4, %v423_v54  ;;  %v444_v56 = vadd.f32 %v443_v55, %v426_v53 }
 0x133   : > { %445 = vst.msk [vmem:[#allocation3] sm:$0x1] %vm424_vm4, %v444_v56 }
 0x134 PF: > { %p672_p4 = scmp.ne.s32.totalorder %s905_s20, 1 }
 0x135   : > { %s468_s20 = sld [smem:[#allocation5]] (!%p672_p4) }
 0x136   : > { %451 = sbr.rel (%p672_p4) target bundleno = 564 (0x234), region = 60 }
 0x13b   : > { %v457_v57 = vld [vmem:[#allocation4 + $0x18] sm:$0xff]  ;;  %vm484_vm5 = vcmask 818176   ;;  %v921_v59 = vmov 0.0   ;;  %v456_v63 = vld [vmem:[#allocation4 + $0x10] sm:$0xff]  ;;  %vm922_vm6 = vmmov 0   ;;  %v455_v3 = vld [vmem:[#allocation4 + $0x8] sm:$0xff]  ;;  %v482_v19 = vstv %s468_s20 }
 0x13c   : > { %v458_v58 = vld [vmem:[#allocation2] sm:$0x1]  ;;  %710 = vmatprep.subr.mxu0 %v921_v59  ;;  %v460_v61 = vld [vmem:[#allocation3] sm:$0x1]  ;;  %718 = vmatprep.mubr.msk.f32.mxu0 %vm922_vm6, %v921_v59  ;;  %v454_v4 = vld [vmem:[#allocation4] sm:$0xff]  ;;  %vm470_vm7 = vcmask 811008  }
 0x13d   : > { %v459_v60 = vmul.f32 0.03125, %v458_v58  ;;  %711 = vmatpush3.xpose.msk.msra.mxu0 %vm484_vm5, %v457_v57  ;;  %v461_v62 = vmul.f32 0.03125, %v460_v61  ;;  %v466_v5 = vld [vmem:[%s1085_s3] sm:$0x1]  ;;  %vm571_vm8 = vcmask 253952  }
 0x13e   : > { %712 = vmatprep.subr.mxu0 %v921_v59 }
 0x13f   : > { %v462_v0 = vmul.f32 %v459_v60, %v459_v60 }
 0x141   : > { %v463_v1 = vsub.f32 %v461_v62, %v462_v0  ;;  %713 = vmatpush3.xpose.msk.msra.mxu0 %vm484_vm5, %v456_v63 }
 0x142   : > { %714 = vmatprep.subr.mxu0 %v921_v59 }
 0x143   : > { %v464_v2 = vadd.f32 1e-05, %v463_v1 }
 0x145   : > { %799 = vrsqrt.f32 %v464_v2  ;;  %715 = vmatpush3.xpose.msk.msra.mxu0 %vm484_vm5, %v455_v3 }
 0x146   : > { %716 = vmatprep.subr.mxu0 %v921_v59 }
 0x149   : > { %717 = vmatpush3.xpose.msk.msra.mxu0 %vm484_vm5, %v454_v4 }
 0x152   : > { %v800_v6 = vpop.eup %799 }
 0x153   : > { %v467_v7 = vmul.f32 %v800_v6, %v466_v5 }
 0x155   : > { %v469_v8 = vmul.f32 %v467_v7, %v459_v60  ;;  %719 = vmatmul.mubr.msk.f32.vlgmr.msra.gmra.mxu0 %vm484_vm5, %v467_v7 }
 0x157   : > { %v471_v9 = vsel %vm470_vm7, %v469_v8, 0.0 }
 0x158   : > { %472 = vadd.xlane.f32.xlu0 %v471_v9 }
 0x1e1   : > { %v473_v10 = vpop.xlane.xlu0 %472 }
 0x1e2   : > { %v474_v11 = vrot.slane %v473_v10, 4 }
 0x1e4   : > { %v475_v12 = vadd.f32 %v474_v11, %v473_v10 }
 0x1e6   : > { %v476_v13 = vrot.slane %v475_v12, 2 }
 0x1e8   : > { %v477_v14 = vadd.f32 %v476_v13, %v475_v12 }
 0x1ea   : > { %v478_v15 = vrot.slane %v477_v14, 1 }
 0x1ec   : > { %v479_v16 = vadd.f32 %v478_v15, %v477_v14 }
 0x1ee   : > { %729 = vpush %v479_v16 }
 0x215   : > { %v566_v17 = vpop.f32.mrf.mxu0 }
 0x217   : > { %v720_v18 = vpop.f32.mrf.mxu0 }
 0x21f   : > { %s730_s24 = spop %729 }
 0x220   : > { %v481_v20 = vstv %s730_s24 }
 0x221   : > { %v483_v21 = vsub.f32 %v482_v19, %v481_v20 }
 0x223   : > { %v567_v22 = vadd.f32 %v566_v17, %v483_v21 }
 0x225   : > { %801 = vtanh.f32 %v567_v22 }
 0x232   : > { %v802_v23 = vpop.eup %801 }
 0x233   : > { %572 = vst.msk [vmem:[#allocation11] sm:$0x1] %vm571_vm8, %v802_v23 }
 0x234 PF: > { %p1058_p8 = scmp.eq.s32.totalorder %s657_s4, 1  ;;  %s923_s26 = smov [#allocation11]  }
 0x235   : > { %s582_s27 = sshll.u32 %s923_s26, 4  ;;  %s583_s27 = int_to_ptr.vmem [resolvable:$true] %s582_s27 }
 0x236   : > { %s855_s28 = scalar_lea.vmem %s583_s27, 16  ;;  %s861_s29 = scalar_lea.vmem %s583_s27, 32 }
 0x237   : > { %p856_p2 = scmp.ne.s32.totalorder %s583_s27, %s855_s28  ;;  %p862_p10 = scmp.lt.s32.totalorder %s583_s27, %s583_s27 }
 0x238   : > { %p863_p11 = scmp.lt.s32.totalorder %s861_s29, %s855_s28 }
 0x239   : > { %p857_p5 = pnand %p856_p2, %p1058_p8 }
 0x23a   : > { %p864_p12 = por %p863_p11, %p862_p10 }
 0x23b   : > { %p858_p9 = pneg %p857_p5 }
 0x23d   : > { %p865_p13 = pnand %p864_p12, %p858_p9 }
 0x23f   : > { %868 = shalt.err (!%p865_p13)
}
 0x240   : > { %740 = dma.vmem_to_hbm [thread:$0]  (%p1058_p8), %s583_s27, 16, %s1087_s5, [#allocation8]  }
 0x241   : > { %900 = dma.done.wait (%p1058_p8), [#allocation8], 16  }
 0x242   : > { %902 = vsyncadd (%p1058_p8), [#allocation8], 4294967280 }
 0x243 PF: > { %s21_s22 = sadd.s32 1, %s913_s22   ;;  %s1093_s20 = smov %s909_s21 }
 0x244   : > { %p18_p0 = scmp.ge.s32.totalorder %s21_s22, 4   ;;  %s1094_s21 = smov %s1096_s23 }
 0x246   :  { %20 = sbr.rel (!%p18_p0) target bundleno = 7 (0x7), region = 96 }
 0x24b   :  { %595 = vsyncpa [#allocation7], 1 }
 0x24c   :  { %597 = vsyncpa [#allocation7 + $0x1], 1 }
 0x24d   :  { %598 = vsyncpa [#allocation10], 1 }
 0x24e   :  { %599 = vsyncpa [#allocation8], 1 }
 0x24f   :  { %601 = vsyncpa [#allocation8 + $0x1], 1 }

</bundles_post_ra>
